<compile_context>
chip_gen: v5e
topology: v5e:2x2
jax: 0.10.0
libtpu: 0.0.40
codegen_flags: <defaults>
</compile_context>

<pallas_src>
import math

import jax
import jax.numpy as jnp
from jax.experimental import pallas as pl
from jax.experimental.pallas import tpu as pltpu


def _done_kernel_vpu(x_ref, w_ref, b_ref, o_ref):
    # x_ref: (bn, H)   w_ref: (1, H)   b_ref: (1, 1)   o_ref: (bn, 1) int8
    x = x_ref[...].astype(jnp.float32)
    w = w_ref[...].astype(jnp.float32)
    y = jnp.sum(x * w, axis=-1, keepdims=True) + b_ref[...]
    # sigmoid(y) > 0.5  <=>  y > 0
    o_ref[...] = (y > 0.0).astype(jnp.int8)


def _done_kernel_mxu(x_ref, w_ref, b_ref, o_ref):
    # x_ref: (bn, H)   w_ref: (H, 1)   b_ref: (1, 1)   o_ref: (bn, 1) int8
    y = jnp.dot(x_ref[...], w_ref[...], preferred_element_type=jnp.float32)
    y = y + b_ref[...]
    o_ref[...] = (y > 0.0).astype(jnp.int8)


def done_forward(x, w, b, *, target_block_bytes=4 * 1024 * 1024):
    """Pallas equivalent of `Done.forward`.

    x: (..., H) float32/bf16; w: (H, 1) (== torch fc.weight.T); b: (1,).
    Returns a bool array of shape (..., 1).
    """
    lead_shape = x.shape[:-1]
    H = x.shape[-1]
    x2 = x.reshape(-1, H)                # flatten batch/time onto sublanes
    N = x2.shape[0]

    # --- Row block from a VMEM byte budget (account for lane padding). ---
    eff_lanes = max(128, ((H + 127) // 128) * 128)
    bytes_per_row = eff_lanes * x2.dtype.itemsize
    bn = max(8, target_block_bytes // bytes_per_row)
    if N > 8:
        # >= 2 grid steps so the "parallel" axis can use both v7x TensorCores.
        bn = min(bn, ((pl.cdiv(N, 2) + 7) // 8) * 8)
    if bn >= N:
        bn = N                            # single full block (any N is legal)
    else:
        bn = max(8, (bn // 8) * 8)        # multiple of 8; ragged last block OK

    grid = (pl.cdiv(N, bn),)

    # --- Small H: VPU/XLU reduction.  Large H: MXU matmul. ---
    use_dot = H > 256
    if use_dot:
        kernel = _done_kernel_mxu
        w2 = w.reshape(H, 1)
        w_spec = pl.BlockSpec((H, 1), lambda i: (0, 0))   # resident in VMEM
    else:
        kernel = _done_kernel_vpu
        w2 = w.reshape(1, H)
        w_spec = pl.BlockSpec((1, H), lambda i: (0, 0))   # resident in VMEM

    cost = pl.CostEstimate(
        flops=2 * N * H,
        transcendentals=0,
        bytes_accessed=N * H * x2.dtype.itemsize + H * w2.dtype.itemsize + N,
    )

    out = pl.pallas_call(
        kernel,
        out_shape=jax.ShapeDtypeStruct((N, 1), jnp.int8),
        grid=grid,
        in_specs=[
            pl.BlockSpec((bn, H), lambda i: (i, 0)),
            w_spec,
            pl.BlockSpec((1, 1), lambda i: (0, 0)),
        ],
        out_specs=pl.BlockSpec((bn, 1), lambda i: (i, 0)),
        compiler_params=pltpu.CompilerParams(
            dimension_semantics=("parallel",)),
        cost_estimate=cost,
    )(x2, w2, b.reshape(1, 1))

    # TODO(synk): direct i1 (bool) VMEM stores are avoided for lowering
    # portability; the int8 -> bool cast below touches only N bytes.
    return out.astype(jnp.bool_).reshape(*lead_shape, 1)


if __name__ == "__main__":
    B, T, HIDDEN = 2, 8, 32

    key = jax.random.PRNGKey(0)
    k_x, k_w, k_b = jax.random.split(key, 3)

    x = jax.random.normal(k_x, (B, T, HIDDEN), jnp.float32)
    s = 1.0 / math.sqrt(HIDDEN)            # nn.Linear default init range
    w = jax.random.uniform(k_w, (HIDDEN, 1), jnp.float32, -s, s)  # = weight.T
    b = jax.random.uniform(k_b, (1,), jnp.float32, -s, s)

    done = done_forward(x, w, b)
    jax.block_until_ready(done)

    # Pure-JAX reference of the PyTorch module: sigmoid(fc(x)) > 0.5
    ref = jax.nn.sigmoid(jnp.einsum("bth,ho->bto", x, w) + b) > 0.5

    assert done.shape == (B, T, 1) and done.dtype == jnp.bool_
    assert bool(jnp.array_equal(done, ref))
    print("KERNEL_OK")
</pallas_src>

<mosaic_0001>
module attributes {stable_mosaic.version = 11 : i64} {
  func.func @_done_kernel_vpu(%arg0: i32, %arg1: memref<8x32xf32, #tpu.memory_space<vmem>>, %arg2: memref<1x32xf32, #tpu.memory_space<vmem>>, %arg3: memref<1x1xf32, #tpu.memory_space<vmem>>, %arg4: memref<8x1xi8, #tpu.memory_space<vmem>>) attributes {dimension_semantics = [#tpu.dimension_semantics<parallel>], iteration_bounds = array<i64: 2>, scalar_prefetch = 0 : i64, scratch_operands = 0 : i64, tpu.core_type = #tpu.core_type<tc>, window_params = [{transform_indices = @transform_0, window_bounds = array<i64: 8, 32>}, {pipeline_mode = #tpu.pipeline_mode<synchronous>, transform_indices = @transform_1, window_bounds = array<i64: 1, 32>}, {pipeline_mode = #tpu.pipeline_mode<synchronous>, transform_indices = @transform_2, window_bounds = array<i64: 1, 1>}, {transform_indices = @transform_3, window_bounds = array<i64: 8, 1>}]} {
    %c0 = arith.constant 0 : index
    %c0_0 = arith.constant 0 : index
    %0 = vector.load %arg1[%c0, %c0_0] : memref<8x32xf32, #tpu.memory_space<vmem>>, vector<8x32xf32>
    %c0_1 = arith.constant 0 : index
    %c0_2 = arith.constant 0 : index
    %1 = vector.load %arg2[%c0_1, %c0_2] : memref<1x32xf32, #tpu.memory_space<vmem>>, vector<1x32xf32>
    %2 = vector.broadcast %1 : vector<1x32xf32> to vector<8x32xf32>
    %3 = arith.mulf %0, %2 : vector<8x32xf32>
    %cst = arith.constant dense<0.000000e+00> : vector<8xf32>
    %4 = vector.multi_reduction <add>, %3, %cst [1] : vector<8x32xf32> to vector<8xf32>
    %5 = vector.shape_cast %4 : vector<8xf32> to vector<8x1xf32>
    %c0_3 = arith.constant 0 : index
    %c0_4 = arith.constant 0 : index
    %6 = vector.load %arg3[%c0_3, %c0_4] : memref<1x1xf32, #tpu.memory_space<vmem>>, vector<1x1xf32>
    %7 = vector.broadcast %6 : vector<1x1xf32> to vector<8x1xf32>
    %8 = arith.addf %5, %7 : vector<8x1xf32>
    %cst_5 = arith.constant 0.000000e+00 : f32
    %9 = vector.broadcast %cst_5 : f32 to vector<8x1xf32>
    %10 = arith.cmpf ogt, %8, %9 : vector<8x1xf32>
    %11 = arith.extui %10 : vector<8x1xi1> to vector<8x1xi8>
    %c0_6 = arith.constant 0 : index
    %c0_7 = arith.constant 0 : index
    %12 = vector.load %arg4[%c0_6, %c0_7] : memref<8x1xi8, #tpu.memory_space<vmem>>, vector<8x1xi8>
    tpu.vector_store %arg4[%c0_6, %c0_7], %11 {strides = array<i32>} : memref<8x1xi8, #tpu.memory_space<vmem>>, vector<8x1xi8>,
    return
  }
  func.func @transform_0(%arg0: i32) -> (i32, i32) {
    %c0_i32 = arith.constant 0 : i32
    %c0_i32_0 = arith.constant 0 : i32
    return %arg0, %c0_i32 : i32, i32
  }
  func.func @transform_1(%arg0: i32) -> (i32, i32) {
    %c0_i32 = arith.constant 0 : i32
    %c0_i32_0 = arith.constant 0 : i32
    %c0_i32_1 = arith.constant 0 : i32
    return %c0_i32, %c0_i32_0 : i32, i32
  }
  func.func @transform_2(%arg0: i32) -> (i32, i32) {
    %c0_i32 = arith.constant 0 : i32
    %c0_i32_0 = arith.constant 0 : i32
    %c0_i32_1 = arith.constant 0 : i32
    return %c0_i32, %c0_i32_0 : i32, i32
  }
  func.func @transform_3(%arg0: i32) -> (i32, i32) {
    %c0_i32 = arith.constant 0 : i32
    %c0_i32_0 = arith.constant 0 : i32
    return %arg0, %c0_i32 : i32, i32
  }
}

</mosaic_0001>

<bundles_post_ra>
// kernel: tpu_custom_call.1
= control target key start
LH: loop header
LB: loop body
LE: loop exit
PB: predicated region body
PF: predicated region fallthrough
CT: control target
= control target key end

     0   :  { %s520_s0 = inlined_call_operand.hbm [shape: f32[16,32], index: 0, kind: input, shape index: {}]   ;;  %s521_s1 = inlined_call_operand.vmem [shape: f32[1,32], index: 1, kind: input, shape index: {}]   ;;  %s522_s2 = inlined_call_operand.<no memory space> [shape: f32[1,1], index: 2, kind: input, shape index: {}]   ;;  %s523_s3 = inlined_call_operand.vmem [shape: s8[16,1], index: 3, kind: output, shape index: {}]  }
   0x1   :  { %v8_v0 = vstv %s522_s2 }
   0x2   :  { %9 = vst [vmem:[#allocation2] sm:$0x1] %v8_v0 }
   0x3   :  { %10 = vsyncpa [#allocation4], 0 }
   0x4   :  { %12 = vsyncpa [#allocation4 + $0x1], 0  ;;  %s423_s14 = smov 0   ;;  %s425_s15 = smov 0  }
   0x5   :  { %s427_s16 = smov 0   ;;  %s429_s17 = smov 0  }
   0x6 LB: > { %s442_s2 = sadd.s32 4294967295, %s397_s17   ;;  %s445_s18 = sadd.s32 1, %s397_s17   ;;  %s397_s17 = sphi %s429_s17, %s530_s17   ;;  %s393_s16 = sphi %s427_s16, %s529_s16   ;;  %s389_s15 = sphi %s425_s15, %s528_s15   ;;  %s385_s14 = sphi %s423_s14, %s527_s14  }
   0x7   : > { %s22_s19 = ssub.s32 %s397_s17, %s445_s18  ;;  %s25_s20 = sadd.s32 1, %s393_s16 }
   0x8   : > { %p23_p0 = scmp.eq.s32.totalorder %s22_s19, 0  ;;  %p32_p1 = scmp.ne.s32.totalorder %s393_s16, %s389_s15 }
   0x9   : > { %p33_p2 = scmp.eq.s32.totalorder %s397_s17, 0  ;;  %p38_p3 = scmp.ne.s32.totalorder %s389_s15, %s385_s14 }
   0xa   : > { %s455_s21 = scalar_select %p23_p0, %s393_s16, %s25_s20  }
   0xb   : > { %p457_p4 = por %p33_p2, %p32_p1  ;;  %p39_p5 = scmp.eq.s32.totalorder %s442_s2, 0 }
   0xc   : > { %p297_p6 = scmp.lt.s32.totalorder %s397_s17, 2  ;;  %s136_s24 = sand.u32 1, %s393_s16  }
   0xd   : > { %p463_p7 = por %p39_p5, %p38_p3  ;;  %s284_s25 = sshll.u32 %s136_s24, 3 }
   0xe   : > { %s285_s26 = sshll.u32 %s397_s17, 3  ;;  %s140_s30 = scalar_lea.vmem [#allocation3], %s284_s25 }
   0xf   : > { %s144_s29 = scalar_lea.hbm %s520_s0, %s285_s26  ;;  %s148_s4 = sshll.u32 %s140_s30, 4  ;;  %s149_s4 = int_to_ptr.vmem [resolvable:$true] %s148_s4 }
  0x10   : > { %s146_s5 = sshll.u32 %s144_s29, 4  ;;  %p474_p8 = pnand %p297_p6, %p457_p4  ;;  %s147_s5 = int_to_ptr.hbm [resolvable:$true] %s146_s5 }
  0x11   : > { %p286_p9 = scmp.ge.s32.totalorder %s397_s17, 1  ;;  %p153_p10 = scmp.lt.s32.totalorder %s397_s17, 3 }
  0x12   : > { %s137_s7 = scalar_lea.sflag [#allocation4], %s136_s24  ;;  %s333_s8 = sshra.s32 %s147_s5, 4  ;;  %s334_s8 = int_to_ptr.hbm [resolvable:$true] %s333_s8 }
  0x13   : > { %s335_s9 = scalar_lea.hbm %s334_s8, 8  ;;  %p337_p12 = pneg %p474_p8 }
  0x14   : > { %p336_p11 = scmp.ne.s32.totalorder %s334_s8, %s335_s9  ;;  %s340_s12 = scalar_lea.hbm %s520_s0, 16 }
  0x15   : > { %p341_p1 = scmp.lt.s32.totalorder %s334_s8, %s520_s0  ;;  %p342_p2 = scmp.lt.s32.totalorder %s340_s12, %s335_s9 }
  0x16   : > { %p338_p13 = pnand %p337_p12, %p336_p11 }
  0x17   : > { %p343_p3 = por %p342_p2, %p341_p1 }
  0x18   : > { %p339_p0 = pneg %p338_p13 }
  0x1a   : > { %p344_p4 = pnand %p343_p3, %p339_p0 }
  0x1c   : > { %347 = shalt.err (!%p344_p4)
}
  0x1d   : > { %296 = dma.hbm_to_vmem [thread:$0]  (!%p474_p8), %s147_s5, 128, %s149_s4, %s137_s7  }
  0x1e   : > { %p154_p5 = pnand %p286_p9, %p153_p10 }
  0x1f   : > { %s159_s19 = sand.u32 (!%p154_p5), 1, %s389_s15  }
  0x20   : > { %157 = sbr.rel (%p154_p5) target bundleno = 168 (0xa8), region = 32  ;;  %s287_s20 = sshll.u32 (!%p154_p5), %s159_s19, 3 }
  0x21   : > { %s160_s22 = scalar_lea.sflag (!%p154_p5), [#allocation4], %s159_s19  ;;  %s163_s24 = scalar_lea.vmem (!%p154_p5), [#allocation3], %s287_s20 }
  0x25   : > { %380 = dma.done.wait (%p463_p7), %s160_s22, 128  }
  0x26   : > { %382 = vsyncadd (%p463_p7), %s160_s22, 4294967168  ;;  %v192_v1 = vld [vmem:[%s163_s24] sm:$0xff]  ;;  %v331_v2 = vld [vmem:[%s521_s1] ss:$0 sm:$0xff]  ;;  %vm198_vm0 = vcmask 261120   ;;  %p186_p6 = scmp.lt.s32.totalorder %s442_s2, 1 }
  0x27   : > { %v197_v3 = vmul.f32 %v331_v2, %v192_v1  ;;  %v332_v5 = vld [vmem:[#allocation2] ss:$0 sm:$0xff]  ;;  %v399_v8 = vmov 0   ;;  %vm214_vm3 = vcmask 1024  }
  0x28   : > { %s532_s2 = smov (!%p186_p6, %s442_s2), 1 }
  0x29   : > { %v199_v4 = vsel %vm198_vm0, %v197_v3, 0.0  ;;  %s288_s17 = sshll.u32 %s532_s2, 1 }
  0x2a   : > { %200 = vadd.xlane.f32.xlu0 %v199_v4  ;;  %s189_s28 = scalar_lea.vmem %s523_s3, %s288_s17 }
  0x9d   : > { %v201_v6 = vpop.xlane.xlu0 %200 }
  0x9e   : > { %v206_v7 = vadd.f32 %v332_v5, %v201_v6 }
  0xa0   : > { %vm207_vm1 = vcmp.gt.f32.partialorder %v206_v7, 0.0 }
  0xa1   : > { %vm208_vm2 = vmpackc.low %vm207_vm1, %vm207_vm1 }
  0xa2   : > { %v209_v9 = vsel %vm208_vm2, 16711935, %v399_v8 }
  0xa3   : > { %v211_v10 = vpack.c.b8 %v209_v9, %v209_v9 }
  0xa5   : > { %vm212_vm4 = vnez %v211_v10 }
  0xa6   : > { %v213_v11 = vsel %vm212_vm4, 16843009, %v399_v8 }
  0xa7   : > { %215 = vst.msk [vmem:[%s189_s28] sm:$0x3] %vm214_vm3, %v213_v11 }
  0xa8 PF: > { %p15_p7 = scmp.ge.s32.totalorder %s445_s18, 4   ;;  %s527_s14 = smov %s389_s15 }
  0xa9   : > { %s528_s15 = smov %s393_s16  ;;  %s529_s16 = smov %s455_s21 }
  0xaa   : > { %s530_s17 = smov %s445_s18  ;;  %17 = sbr.rel (!%p15_p7) target bundleno = 6 (0x6), region = 72 }
  0xaf   :  { %235 = vsyncpa [#allocation4], 1 }
  0xb0   :  { %237 = vsyncpa [#allocation4 + $0x1], 1 }

</bundles_post_ra>
